<compile_context>
chip_gen: v6e
topology: v6e:2x2x1
jax: 0.10.0
libtpu: 0.0.40
codegen_flags: <defaults>
</compile_context>

<pallas_src>
import functools

import jax
import jax.numpy as jnp
from jax.experimental import pallas as pl
from jax.experimental.pallas import tpu as pltpu


def _ce_loss_kernel(x_ref, t_ref, o_ref, *, l_true, tiles_per_super):
    """x_ref/t_ref: (N, C, TL) VMEM tiles; o_ref: (1, N, TL) resident per-lane accumulator."""
    s = pl.program_id(0)          # pixel super-block ("parallel": megacore on v7x)
    j = pl.program_id(1)          # pixel tile within super-block ("arbitrary" reduction)

    x = x_ref[...]                # (N, C, TL) logits, native dtype (no eager f32 copy)
    t = t_ref[...]                # (N, C, TL) target scores, native dtype
    n, c, tl = x.shape

    # --- argmax over channels, first-index tie-break (matches torch.argmax) ---
    ch = jax.lax.broadcasted_iota(jnp.int32, (1, c, 1), 1)               # broadcast iota
    t_max = jnp.max(t, axis=1, keepdims=True)                            # (N,1,TL)
    idx = jnp.min(jnp.where(t == t_max, ch, c), axis=1, keepdims=True)   # (N,1,TL) int32

    # --- per-pixel cross entropy: logsumexp_c(x) - x[target] (no materialized one_hot) ---
    x_max = jnp.max(x, axis=1, keepdims=True)                            # native dtype
    ex = jnp.exp((x - x_max).astype(jnp.float32))                        # f32 only inside exp
    lse = jnp.log(jnp.sum(ex, axis=1, keepdims=True)) + x_max.astype(jnp.float32)
    tgt = jnp.sum(jnp.where(ch == idx, x, jnp.zeros((), x.dtype)),
                  axis=1, keepdims=True).astype(jnp.float32)             # one-hot sum: exact
    loss = (lse - tgt)[:, 0, :]                                          # (N, TL) f32

    # --- mask out-of-range pixels BEFORE accumulation (ragged edge blocks read garbage) ---
    tile_idx = s * tiles_per_super + j
    lane = jax.lax.broadcasted_iota(jnp.int32, (1, tl), 1)
    loss = jnp.where(tile_idx * tl + lane < l_true, loss, 0.0)

    @pl.when(j == 0)
    def _():
        o_ref[...] = jnp.zeros_like(o_ref)

    # per-lane accumulation: pure VPU adds, no per-step cross-lane reduce
    o_ref[...] += loss[None]


def _round_up(v, m):
    return -(-v // m) * m


def _tpu_defaults():
    """Generation-aware sizing.  v5e/v6e: 128 MiB VMEM, 1 TC.  v7x: 64 MiB VMEM, 2 TCs.
    Unknown / query failure falls back to the conservative (v7x-safe) settings."""
    big = dict(num_super=1, target_step_bytes=24 << 20,
               vmem_budget_bytes=64 << 20, vmem_limit_bytes=100 << 20)
    small = dict(num_super=2, target_step_bytes=12 << 20,
                 vmem_budget_bytes=36 << 20, vmem_limit_bytes=50 << 20)
    kind = ""
    try:
        kind = jax.devices()[0].device_kind.lower()
    except Exception:
        pass
    if any(k in kind for k in ("v4", "v5", "v6")):
        return big
    if "7" in kind:
        return small
    try:
        if int(getattr(pltpu.get_tpu_info(), "vmem_capacity_bytes", 0)) >= (96 << 20):
            return big
    except Exception:
        pass
    return small


def _choose_tile_l(n, c, in_dtype, tgt_dtype, target_step_bytes, vmem_budget_bytes):
    """Largest multiple-of-128 pixel tile moving ~target_step_bytes of HBM per grid step
    while keeping the FULL VMEM working set (double-buffered input DMA with sublane
    padding + resident f32 accumulator + in-kernel full-tile temporaries) in budget."""
    in_b = jnp.dtype(in_dtype).itemsize
    tg_b = jnp.dtype(tgt_dtype).itemsize

    def cpad(b):                       # channel dim padded to sublane pack
        return _round_up(c, 8 * max(1, 4 // b))

    npad = _round_up(n, 8)
    hbm_per_lane = n * c * (in_b + tg_b)                                 # HBM bytes / pixel / step
    dma = 2 * n * (cpad(in_b) * in_b + cpad(tg_b) * tg_b)                # 2 buffers per input
    acc = 2 * npad * 4                                                   # (1,n,tile) f32 output
    temps = 4 * n * cpad(4) * 4                                          # ~4 f32 full-tile temps
    vmem_per_lane = dma + acc + temps

    tile = min(target_step_bytes // hbm_per_lane, vmem_budget_bytes // vmem_per_lane)
    return max(128, (int(tile) // 128) * 128)


def ce_loss(inputs, targets, *, tile_l=None, num_super=None,
            target_step_bytes=None, vmem_budget_bytes=None, vmem_limit_bytes=None):
    """inputs, targets: (N, C, H, W) -> per-sample mean CE loss, shape (N,), float32."""
    n, c, h, w = inputs.shape
    L = h * w
    x = inputs.reshape(n, c, L)
    t = targets.reshape(n, c, L)

    cfg = _tpu_defaults()
    num_super = cfg["num_super"] if num_super is None else int(num_super)
    target_step_bytes = cfg["target_step_bytes"] if target_step_bytes is None else int(target_step_bytes)
    vmem_budget_bytes = cfg["vmem_budget_bytes"] if vmem_budget_bytes is None else int(vmem_budget_bytes)
    vmem_limit_bytes = cfg["vmem_limit_bytes"] if vmem_limit_bytes is None else int(vmem_limit_bytes)

    if L < 128:
        tile_l = L                                   # single block equal to the full last dim
    else:
        if tile_l is None:
            tile_l = _choose_tile_l(n, c, inputs.dtype, targets.dtype,
                                    target_step_bytes, vmem_budget_bytes)
        else:
            tile_l = max(128, (int(tile_l) // 128) * 128)
        tile_l = min(tile_l, (L // 128) * 128)       # never larger than the array's last dim

    total_tiles = pl.cdiv(L, tile_l)
    num_super = max(1, min(num_super, total_tiles))
    tiles_per_super = pl.cdiv(total_tiles, num_super)

    kernel = functools.partial(_ce_loss_kernel, l_true=L,
                               tiles_per_super=tiles_per_super)

    # Clamp the block index so super-block overshoot steps re-read the last valid tile
    # instead of requesting a block fully outside the array; the in-kernel lane mask
    # (which uses the UNclamped tile index) zeroes their entire contribution.
    def in_map(s, j):
        return (0, 0, jnp.minimum(s * tiles_per_super + j, total_tiles - 1))

    out = pl.pallas_call(
        kernel,
        out_shape=jax.ShapeDtypeStruct((num_super, n, tile_l), jnp.float32),
        grid=(num_super, tiles_per_super),
        in_specs=[
            pl.BlockSpec((n, c, tile_l), in_map),
            pl.BlockSpec((n, c, tile_l), in_map),
        ],
        # output block index constant across j -> VMEM-resident accumulator per super-block
        out_specs=pl.BlockSpec((1, n, tile_l), lambda s, j: (s, 0, 0)),
        compiler_params=pltpu.CompilerParams(
            dimension_semantics=("parallel", "arbitrary"),
            vmem_limit_bytes=vmem_limit_bytes,
        ),
    )(x, t)

    # tiny final reduction over super-blocks + lanes, mean over the TRUE pixel count
    return out.sum(axis=(0, 2)) / jnp.float32(L)


def ce_loss_ref(inputs, targets):
    """Pure-JAX reference matching the PyTorch module."""
    n, c, h, w = inputs.shape
    x = inputs.reshape(n, c, -1)
    t = targets.reshape(n, c, -1)
    tgt = jnp.argmax(t, axis=1)
    logp = jax.nn.log_softmax(x, axis=1)
    loss = -jnp.take_along_axis(logp, tgt[:, None, :], axis=1)[:, 0, :]
    return loss.mean(axis=1)


if __name__ == "__main__":
    key = jax.random.PRNGKey(0)
    k1, k2 = jax.random.split(key)

    # Main check: shapes consistent with the module spec.
    N, C, H, W = 2, 4, 16, 16
    inputs = jax.random.normal(k1, (N, C, H, W), dtype=jnp.float32)
    targets = jax.random.normal(k2, (N, C, H, W), dtype=jnp.float32)
    loss = ce_loss(inputs, targets)
    jax.block_until_ready(loss)
    ref = ce_loss_ref(inputs, targets)
    assert loss.shape == (N,)
    assert jnp.allclose(loss, ref, rtol=1e-5, atol=1e-5), (loss, ref)

    # Extra checks:
    #  (a) L < 128            -> single full-width block (no padding anywhere),
    #  (b) ragged multi-tile + 2 super-blocks -> parallel axis, edge-block mask, clamp.
    for shape, kwargs in (((2, 4, 10, 10), {}),
                          ((2, 4, 16, 50), dict(tile_l=128, num_super=2))):
        ka, kb = jax.random.split(jax.random.PRNGKey(sum(shape)))
        xi = jax.random.normal(ka, shape, dtype=jnp.float32)
        ti = jax.random.normal(kb, shape, dtype=jnp.float32)
        got = ce_loss(xi, ti, **kwargs)
        jax.block_until_ready(got)
        want = ce_loss_ref(xi, ti)
        assert jnp.allclose(got, want, rtol=1e-5, atol=1e-5), (shape, got, want)

    print("KERNEL_OK")
</pallas_src>

<mosaic_0001>
module attributes {stable_mosaic.version = 11 : i64} {
  func.func @_ce_loss_kernel(%arg0: i32, %arg1: i32, %arg2: memref<2x4x256xf32, #tpu.memory_space<vmem>>, %arg3: memref<2x4x256xf32, #tpu.memory_space<vmem>>, %arg4: memref<1x2x256xf32, #tpu.memory_space<vmem>>) attributes {dimension_semantics = [#tpu.dimension_semantics<parallel>, #tpu.dimension_semantics<arbitrary>], iteration_bounds = array<i64: 1, 1>, scalar_prefetch = 0 : i64, scratch_operands = 0 : i64, tpu.core_type = #tpu.core_type<tc>, window_params = [{transform_indices = @transform_0, window_bounds = array<i64: 2, 4, 256>}, {transform_indices = @transform_1, window_bounds = array<i64: 2, 4, 256>}, {transform_indices = @transform_2, window_bounds = array<i64: 1, 2, 256>}]} {
    %c0 = arith.constant 0 : index
    %c0_0 = arith.constant 0 : index
    %c0_1 = arith.constant 0 : index
    %0 = vector.load %arg2[%c0, %c0_0, %c0_1] : memref<2x4x256xf32, #tpu.memory_space<vmem>>, vector<2x4x256xf32>
    %c0_2 = arith.constant 0 : index
    %c0_3 = arith.constant 0 : index
    %c0_4 = arith.constant 0 : index
    %1 = vector.load %arg3[%c0_2, %c0_3, %c0_4] : memref<2x4x256xf32, #tpu.memory_space<vmem>>, vector<2x4x256xf32>
    %2 = tpu.iota {dimensions = array<i32: 1>} : vector<1x4x1xi32>
    %cst = arith.constant dense<0xFF800000> : vector<2x256xf32>
    %3 = vector.multi_reduction <maximumf>, %1, %cst [1] : vector<2x4x256xf32> to vector<2x256xf32>
    %4 = vector.shape_cast %3 : vector<2x256xf32> to vector<2x1x256xf32>
    %5 = vector.broadcast %4 : vector<2x1x256xf32> to vector<2x4x256xf32>
    %6 = arith.cmpf oeq, %1, %5 : vector<2x4x256xf32>
    %c4_i32 = arith.constant 4 : i32
    %7 = vector.shape_cast %2 : vector<1x4x1xi32> to vector<1x4x1xi32>
    %8 = vector.broadcast %7 : vector<1x4x1xi32> to vector<2x4x256xi32>
    %9 = vector.broadcast %c4_i32 : i32 to vector<2x4x256xi32>
    %10 = arith.select %6, %8, %9 : vector<2x4x256xi1>, vector<2x4x256xi32>
    %cst_5 = arith.constant dense<2147483647> : vector<2x256xi32>
    %11 = vector.multi_reduction <minsi>, %10, %cst_5 [1] : vector<2x4x256xi32> to vector<2x256xi32>
    %12 = vector.shape_cast %11 : vector<2x256xi32> to vector<2x1x256xi32>
    %cst_6 = arith.constant dense<0xFF800000> : vector<2x256xf32>
    %13 = vector.multi_reduction <maximumf>, %0, %cst_6 [1] : vector<2x4x256xf32> to vector<2x256xf32>
    %14 = vector.shape_cast %13 : vector<2x256xf32> to vector<2x1x256xf32>
    %15 = vector.broadcast %14 : vector<2x1x256xf32> to vector<2x4x256xf32>
    %16 = arith.subf %0, %15 : vector<2x4x256xf32>
    %17 = math.exp %16 : vector<2x4x256xf32>
    %cst_7 = arith.constant dense<0.000000e+00> : vector<2x256xf32>
    %18 = vector.multi_reduction <add>, %17, %cst_7 [1] : vector<2x4x256xf32> to vector<2x256xf32>
    %19 = vector.shape_cast %18 : vector<2x256xf32> to vector<2x1x256xf32>
    %20 = math.log %19 : vector<2x1x256xf32>
    %21 = arith.addf %20, %14 : vector<2x1x256xf32>
    %22 = vector.broadcast %2 : vector<1x4x1xi32> to vector<2x4x256xi32>
    %23 = vector.broadcast %12 : vector<2x1x256xi32> to vector<2x4x256xi32>
    %24 = arith.cmpi eq, %22, %23 : vector<2x4x256xi32>
    %cst_8 = arith.constant 0.000000e+00 : f32
    %25 = vector.broadcast %cst_8 : f32 to vector<2x4x256xf32>
    %26 = arith.select %24, %0, %25 : vector<2x4x256xi1>, vector<2x4x256xf32>
    %cst_9 = arith.constant dense<0.000000e+00> : vector<2x256xf32>
    %27 = vector.multi_reduction <add>, %26, %cst_9 [1] : vector<2x4x256xf32> to vector<2x256xf32>
    %28 = vector.shape_cast %27 : vector<2x256xf32> to vector<2x1x256xf32>
    %29 = arith.subf %21, %28 : vector<2x1x256xf32>
    %30 = vector.shape_cast %29 : vector<2x1x256xf32> to vector<2x256xf32>
    %c1_i32 = arith.constant 1 : i32
    %31 = arith.muli %arg0, %c1_i32 : i32
    %32 = arith.addi %31, %arg1 : i32
    %33 = tpu.iota {dimensions = array<i32: 1>} : vector<1x256xi32>
    %c256_i32 = arith.constant 256 : i32
    %34 = arith.muli %32, %c256_i32 : i32
    %35 = vector.broadcast %34 : i32 to vector<1x256xi32>
    %36 = arith.addi %35, %33 : vector<1x256xi32>
    %c256_i32_10 = arith.constant 256 : i32
    %37 = vector.broadcast %c256_i32_10 : i32 to vector<1x256xi32>
    %38 = arith.cmpi slt, %36, %37 : vector<1x256xi32>
    %cst_11 = arith.constant 0.000000e+00 : f32
    %39 = vector.shape_cast %38 : vector<1x256xi1> to vector<1x256xi1>
    %40 = vector.broadcast %39 : vector<1x256xi1> to vector<2x256xi1>
    %41 = vector.broadcast %cst_11 : f32 to vector<2x256xf32>
    %42 = arith.select %40, %30, %41 : vector<2x256xi1>, vector<2x256xf32>
    %c0_i32 = arith.constant 0 : i32
    %43 = arith.cmpi eq, %arg1, %c0_i32 : i32
    %44 = arith.extui %43 : i1 to i32
    %c0_i32_12 = arith.constant 0 : i32
    %45 = arith.cmpi ne, %44, %c0_i32_12 : i32
    scf.if %45 {
      %cst_19 = arith.constant 0.000000e+00 : f32
      %50 = vector.broadcast %cst_19 : f32 to vector<1x2x256xf32>
      %c0_20 = arith.constant 0 : index
      %c0_21 = arith.constant 0 : index
      %c0_22 = arith.constant 0 : index
      %51 = vector.load %arg4[%c0_20, %c0_21, %c0_22] : memref<1x2x256xf32, #tpu.memory_space<vmem>>, vector<1x2x256xf32>
      tpu.vector_store %arg4[%c0_20, %c0_21, %c0_22], %50 {strides = array<i32>} : memref<1x2x256xf32, #tpu.memory_space<vmem>>, vector<1x2x256xf32>,
    } else {
    }
    %c0_13 = arith.constant 0 : index
    %c0_14 = arith.constant 0 : index
    %c0_15 = arith.constant 0 : index
    %46 = vector.load %arg4[%c0_13, %c0_14, %c0_15] : memref<1x2x256xf32, #tpu.memory_space<vmem>>, vector<1x2x256xf32>
    %47 = vector.shape_cast %42 : vector<2x256xf32> to vector<1x2x256xf32>
    %48 = arith.addf %46, %47 : vector<1x2x256xf32>
    %c0_16 = arith.constant 0 : index
    %c0_17 = arith.constant 0 : index
    %c0_18 = arith.constant 0 : index
    %49 = vector.load %arg4[%c0_16, %c0_17, %c0_18] : memref<1x2x256xf32, #tpu.memory_space<vmem>>, vector<1x2x256xf32>
    tpu.vector_store %arg4[%c0_16, %c0_17, %c0_18], %48 {strides = array<i32>} : memref<1x2x256xf32, #tpu.memory_space<vmem>>, vector<1x2x256xf32>,
    return
  }
  func.func @transform_0(%arg0: i32, %arg1: i32) -> (i32, i32, i32) {
    %c1_i32 = arith.constant 1 : i32
    %0 = arith.muli %arg0, %c1_i32 : i32
    %1 = arith.addi %0, %arg1 : i32
    %c0_i32 = arith.constant 0 : i32
    %2 = arith.minsi %1, %c0_i32 : i32
    %c0_i32_0 = arith.constant 0 : i32
    %c0_i32_1 = arith.constant 0 : i32
    %c0_i32_2 = arith.constant 0 : i32
    return %c0_i32_0, %c0_i32_1, %2 : i32, i32, i32
  }
  func.func @transform_1(%arg0: i32, %arg1: i32) -> (i32, i32, i32) {
    %c1_i32 = arith.constant 1 : i32
    %0 = arith.muli %arg0, %c1_i32 : i32
    %1 = arith.addi %0, %arg1 : i32
    %c0_i32 = arith.constant 0 : i32
    %2 = arith.minsi %1, %c0_i32 : i32
    %c0_i32_0 = arith.constant 0 : i32
    %c0_i32_1 = arith.constant 0 : i32
    %c0_i32_2 = arith.constant 0 : i32
    return %c0_i32_0, %c0_i32_1, %2 : i32, i32, i32
  }
  func.func @transform_2(%arg0: i32, %arg1: i32) -> (i32, i32, i32) {
    %c0_i32 = arith.constant 0 : i32
    %c0_i32_0 = arith.constant 0 : i32
    %c0_i32_1 = arith.constant 0 : i32
    return %arg0, %c0_i32, %c0_i32_0 : i32, i32, i32
  }
}

</mosaic_0001>

<bundles_post_ra>
// kernel: tpu_custom_call.1
= control target key start
LH: loop header
LB: loop body
LE: loop exit
PB: predicated region body
PF: predicated region fallthrough
CT: control target
= control target key end

     0   :  { %7 = vsyncpa [#allocation3], 0  ;;  %s561_s0 = inlined_call_operand.hbm [shape: f32[2,4,256], index: 0, kind: input, shape index: {}]   ;;  %s562_s1 = inlined_call_operand.hbm [shape: f32[2,4,256], index: 1, kind: input, shape index: {}]   ;;  %s563_s2 = inlined_call_operand.hbm [shape: f32[1,2,256], index: 2, kind: output, shape index: {}]  }
   0x1   :  { %8 = vsyncpa [#allocation6], 0 }
   0x2   :  { %9 = vsyncpa [#allocation4], 0  ;;  %s450_s9 = smov [#allocation2]  }
   0x3   :  { %s21_s10 = sshll.u32 %s450_s9, 4  ;;  %s22_s10 = int_to_ptr.vmem [resolvable:$true] %s21_s10 }
   0x4   :  { %s392_s11 = scalar_lea.vmem %s22_s10, 256  ;;  %p397_p1 = scmp.lt.s32.totalorder %s22_s10, %s22_s10 }
   0x5   :  { %p393_p0 = scmp.ne.s32.totalorder %s22_s10, %s392_s11  ;;  %p398_p2 = scmp.lt.s32.totalorder %s392_s11, %s392_s11 }
   0x7   :  { %p399_p3 = por %p398_p2, %p397_p1 }
   0x9   :  { %p400_p4 = pnand %p399_p3, %p393_p0 }
   0xb   :  { %403 = shalt.err (!%p400_p4)
}
   0xc   :  { %s451_s12 = smov 128   ;;  %s452_s13 = smov 8  }
   0xd   :  { %27 = dma.hbm_to_vmem [thread:$0]  %s561_s0, 256, %s22_s10, [#allocation3], %s451_s12, %s451_s12, %s452_s13  }
   0xe   :  { %s453_s16 = smov [#allocation5]  }
   0xf   :  { %s39_s17 = sshll.u32 %s453_s16, 4  ;;  %s40_s17 = int_to_ptr.vmem [resolvable:$true] %s39_s17 }
  0x10   :  { %s412_s18 = scalar_lea.vmem %s40_s17, 256  ;;  %p417_p6 = scmp.lt.s32.totalorder %s40_s17, %s40_s17 }
  0x11   :  { %p413_p5 = scmp.ne.s32.totalorder %s40_s17, %s412_s18  ;;  %p418_p7 = scmp.lt.s32.totalorder %s412_s18, %s412_s18 }
  0x13   :  { %p419_p8 = por %p418_p7, %p417_p6 }
  0x15   :  { %p420_p9 = pnand %p419_p8, %p413_p5 }
  0x17   :  { %423 = shalt.err (!%p420_p9)
}
  0x18   :  { %45 = dma.hbm_to_vmem [thread:$0]  %s562_s1, 256, %s40_s17, [#allocation6], %s451_s12, %s451_s12, %s452_s13  }
  0x19   :  { %444 = dma.done.wait [#allocation3], 256  }
  0x1a   :  { %445 = vsyncadd [#allocation3], 4294967040 }
  0x1b   :  { %446 = dma.done.wait [#allocation6], 256  }
  0x1c   :  { %447 = vsyncadd [#allocation6], 4294967040  ;;  %v64_v0 = vlaneseq  ;;  %v454_v1 = vmov 0.0   ;;  %v455_v2 = vmov 839922192   ;;  %vm72_vm0 = vcmask 1043456  }
  0x1d   :  { %325 = vst [vmem:[#allocation7] sm:$0xf] %v454_v1  ;;  %v112_v3 = vunpack.c.l.s4 %v455_v2  ;;  %v481_v6 = vld [vmem:[#allocation2] sm:$0xff]  ;;  %v483_v7 = vld [vmem:[#allocation2 + $0x8] sm:$0xff]  ;;  %v485_v8 = vld [vmem:[#allocation5] sm:$0xff]  ;;  %s457_s0 = smov [#allocation7]  }
  0x1e   :  { %v479_v4 = vshrl.u32 %v64_v0, 7  ;;  %v488_v10 = vld [vmem:[#allocation5 + $0x8] sm:$0xff]  ;;  %v68_v11 = vcombine.high %v485_v8, %v485_v8  ;;  %v73_v12 = vsel %vm72_vm0, %v485_v8, -inf  ;;  %v496_v13 = vcombine.high %v481_v6, %v481_v6  ;;  %s346_s1 = sshll.u32 %s457_s0, 4  ;;  %s347_s1 = int_to_ptr.vmem [resolvable:$true] %s346_s1 }
  0x1f   :  { %v113_v5 = vunpack.c.0.s8 %v112_v3  ;;  %v500_v14 = vcombine.high %v483_v7, %v483_v7  ;;  %v69_v15 = vcombine.high %v488_v10, %v488_v10  ;;  %v74_v16 = vrot.slane %v73_v12, 4  ;;  %s424_s21 = scalar_lea.vmem %s347_s1, 64  ;;  %p429_p11 = scmp.lt.s32.totalorder %s347_s1, %s347_s1 }
  0x20   :  { %v87_v17 = vsel %vm72_vm0, %v488_v10, -inf  ;;  %v168_v18 = vsel %vm72_vm0, %v481_v6, -inf  ;;  %v80_v19 = vsel %vm72_vm0, %v68_v11, -inf  ;;  %v175_v22 = vsel %vm72_vm0, %v496_v13, -inf  ;;  %p425_p10 = scmp.ne.s32.totalorder %s347_s1, %s424_s21  ;;  %p430_p12 = scmp.lt.s32.totalorder %s424_s21, %s424_s21 }
  0x21   :  { %v116_v9 = vsub.s32 %v113_v5, %v479_v4  ;;  %v88_v20 = vrot.slane %v87_v17, 4  ;;  %v169_v21 = vrot.slane %v168_v18, 4  ;;  %v75_v23 = vmax.f32 %v73_v12, %v74_v16 }
  0x22   :  { %v81_v24 = vrot.slane %v80_v19, 4  ;;  %v94_v25 = vsel %vm72_vm0, %v69_v15, -inf  ;;  %v176_v26 = vrot.slane %v175_v22, 4  ;;  %v182_v30 = vsel %vm72_vm0, %v483_v7, -inf  ;;  %p431_p13 = por %p430_p12, %p429_p11 }
  0x23   :  { %v89_v27 = vmax.f32 %v87_v17, %v88_v20  ;;  %v95_v28 = vrot.slane %v94_v25, 4  ;;  %v170_v29 = vmax.f32 %v168_v18, %v169_v21  ;;  %v76_v31 = vrot.slane %v75_v23, 2 }
  0x24   :  { %v82_v32 = vmax.f32 %v80_v19, %v81_v24  ;;  %v177_v33 = vmax.f32 %v175_v22, %v176_v26  ;;  %v183_v34 = vrot.slane %v182_v30, 4  ;;  %v189_v38 = vsel %vm72_vm0, %v500_v14, -inf  ;;  %p432_p0 = pnand %p431_p13, %p425_p10 }
  0x25   :  { %v90_v35 = vrot.slane %v89_v27, 2  ;;  %v96_v36 = vmax.f32 %v94_v25, %v95_v28  ;;  %v171_v37 = vrot.slane %v170_v29, 2  ;;  %v77_v39 = vmax.f32 %v75_v23, %v76_v31 }
  0x26   :  { %v83_v40 = vrot.slane %v82_v32, 2  ;;  %v178_v41 = vrot.slane %v177_v33, 2  ;;  %v184_v42 = vmax.f32 %v182_v30, %v183_v34  ;;  %v190_v46 = vrot.slane %v189_v38, 4 }
  0x27   :  { %v91_v43 = vmax.f32 %v89_v27, %v90_v35  ;;  %v97_v44 = vrot.slane %v96_v36, 2  ;;  %v172_v45 = vmax.f32 %v170_v29, %v171_v37  ;;  %v78_v47 = vrot.slane %v77_v39, 1 }
  0x28   :  { %v84_v48 = vmax.f32 %v82_v32, %v83_v40  ;;  %v179_v49 = vmax.f32 %v177_v33, %v178_v41  ;;  %v185_v50 = vrot.slane %v184_v42, 2  ;;  %v191_v54 = vmax.f32 %v189_v38, %v190_v46 }
  0x29   :  { %v92_v51 = vrot.slane %v91_v43, 1  ;;  %v98_v52 = vmax.f32 %v96_v36, %v97_v44  ;;  %v173_v53 = vrot.slane %v172_v45, 1  ;;  %v79_v55 = vmax.f32 %v77_v39, %v78_v47 }
  0x2a   :  { %v85_v56 = vrot.slane %v84_v48, 1  ;;  %v180_v57 = vrot.slane %v179_v49, 1  ;;  %v186_v58 = vmax.f32 %v184_v42, %v185_v50  ;;  %v192_v62 = vrot.slane %v191_v54, 2 }
  0x2b   :  { %v93_v59 = vmax.f32 %v91_v43, %v92_v51  ;;  %v99_v60 = vrot.slane %v98_v52, 1  ;;  %v516_v61 = vmax.f32 %v172_v45, %v173_v53  ;;  %v117_v3 = vrot.slane %v479_v4, %v116_v9 }
  0x2c   :  { %v86_v63 = vmax.f32 %v84_v48, %v85_v56  ;;  %v518_v0 = vmax.f32 %v179_v49, %v180_v57  ;;  %v187_v1 = vrot.slane %v186_v58, 1  ;;  %v193_v5 = vmax.f32 %v191_v54, %v192_v62 }
  0x2d   :  { %v100_v2 = vmax.f32 %v98_v52, %v99_v60 }
  0x2e   :  { %v105_v11 = vcombine.low %v79_v55, %v86_v63  ;;  %v200_v12 = vcombine.low %v516_v61, %v518_v0  ;;  %v523_v16 = vmax.f32 %v186_v58, %v187_v1  ;;  %v194_v17 = vrot.slane %v193_v5, 1 }
  0x2f   :  { %v106_v15 = vcombine.low %v93_v59, %v100_v2 }
  0x30   :  { %vm109_vm1 = vcmp.eq.f32.partialorder %v485_v8, %v105_v11  ;;  %v204_v18 = vsub.f32 %v481_v6, %v200_v12  ;;  %v528_v20 = vmax.f32 %v193_v5, %v194_v17 }
  0x31   :  { %vm110_vm2 = vcmp.eq.f32.partialorder %v488_v10, %v106_v15  ;;  %v118_v19 = vsel %vm109_vm1, %v117_v3, 4 }
  0x32   :  { %v119_v21 = vsel %vm110_vm2, %v117_v3, 4  ;;  %v120_v9 = vcombine.high %v118_v19, %v118_v19  ;;  %v122_v22 = vsel %vm72_vm0, %v118_v19, 2147483647  ;;  %v206_v23 = vmul.f32 1.442695, %v204_v18 }
  0x33   :  { %v121_v24 = vcombine.high %v119_v21, %v119_v21  ;;  %v123_v25 = vrot.slane %v122_v22, 4  ;;  %v142_v26 = vsel %vm72_vm0, %v119_v21, 2147483647  ;;  %v201_v27 = vcombine.low %v523_v16, %v528_v20 }
  0x34   :  { %v132_v8 = vsel %vm72_vm0, %v120_v9, 2147483647  ;;  %v143_v28 = vrot.slane %v142_v26, 4  ;;  %372 = vpow2.f32 %v206_v23 }
  0x35   :  { %vm124_vm3 = vcmp.lt.s32.totalorder %v122_v22, %v123_v25  ;;  %v133_v10 = vrot.slane %v132_v8, 4  ;;  %v152_v29 = vsel %vm72_vm0, %v121_v24, 2147483647  ;;  %v205_v30 = vsub.f32 %v483_v7, %v201_v27 }
  0x36   :  { %v125_v31 = vsel %vm124_vm3, %v122_v22, %v123_v25  ;;  %vm144_vm4 = vcmp.lt.s32.totalorder %v142_v26, %v143_v28  ;;  %v153_v32 = vrot.slane %v152_v29, 4 }
  0x37   :  { %v126_v33 = vrot.slane %v125_v31, 2  ;;  %vm134_vm5 = vcmp.lt.s32.totalorder %v132_v8, %v133_v10  ;;  %v145_v34 = vsel %vm144_vm4, %v142_v26, %v143_v28  ;;  %v208_v35 = vmul.f32 1.442695, %v205_v30 }
  0x38   :  { %v135_v36 = vsel %vm134_vm5, %v132_v8, %v133_v10  ;;  %v146_v37 = vrot.slane %v145_v34, 2  ;;  %vm154_vm6 = vcmp.lt.s32.totalorder %v152_v29, %v153_v32 }
  0x39   :  { %vm127_vm7 = vcmp.lt.s32.totalorder %v125_v31, %v126_v33  ;;  %v136_v38 = vrot.slane %v135_v36, 2  ;;  %v155_v39 = vsel %vm154_vm6, %v152_v29, %v153_v32  ;;  %374 = vpow2.f32 %v208_v35 }
  0x3a   :  { %v128_v40 = vsel %vm127_vm7, %v125_v31, %v126_v33  ;;  %vm147_vm8 = vcmp.lt.s32.totalorder %v145_v34, %v146_v37  ;;  %v156_v41 = vrot.slane %v155_v39, 2 }
  0x3b   :  { %v129_v42 = vrot.slane %v128_v40, 1  ;;  %vm137_vm9 = vcmp.lt.s32.totalorder %v135_v36, %v136_v38  ;;  %v148_v43 = vsel %vm147_vm8, %v145_v34, %v146_v37 }
  0x3c   :  { %v138_v44 = vsel %vm137_vm9, %v135_v36, %v136_v38  ;;  %v149_v45 = vrot.slane %v148_v43, 1  ;;  %vm157_vm10 = vcmp.lt.s32.totalorder %v155_v39, %v156_v41 }
  0x3d   :  { %vm130_vm11 = vcmp.lt.s32.totalorder %v128_v40, %v129_v42  ;;  %v139_v46 = vrot.slane %v138_v44, 1  ;;  %v158_v47 = vsel %vm157_vm10, %v155_v39, %v156_v41 }
  0x3e   :  { %v159_v48 = vrot.slane %v158_v47, 1  ;;  %vm150_vm13 = vcmp.lt.s32.totalorder %v148_v43, %v149_v45  ;;  %v131_v49 = vsel %vm130_vm11, %v128_v40, %v129_v42 }
  0x3f   :  { %vm140_vm12 = vcmp.lt.s32.totalorder %v138_v44, %v139_v46  ;;  %v151_v52 = vsel %vm150_vm13, %v148_v43, %v149_v45  ;;  %vm256_vm15 = vcmp.eq.s32.totalorder %v479_v4, %v131_v49 }
  0x40   :  { %vm160_vm14 = vcmp.lt.s32.totalorder %v158_v47, %v159_v48  ;;  %v141_v51 = vsel %vm140_vm12, %v138_v44, %v139_v46  ;;  %vm258_vm2 = vcmp.eq.s32.totalorder %v479_v4, %v151_v52  ;;  %v260_v62 = vsel %vm256_vm15, %v481_v6, 0.0 }
  0x41   :  { %v373_v50 = vpop.eup %372  ;;  %v161_v55 = vsel %vm160_vm14, %v158_v47, %v159_v48  ;;  %vm257_vm1 = vcmp.eq.s32.totalorder %v479_v4, %v141_v51  ;;  %v262_v12 = vsel %vm258_vm2, %v483_v7, 0.0  ;;  %v264_v19 = vsel %vm72_vm0, %v260_v62, 0.0 }
  0x42   :  { %v212_v53 = vcombine.high %v373_v50, %v373_v50  ;;  %v216_v54 = vsel %vm72_vm0, %v373_v50, 0.0  ;;  %vm259_vm3 = vcmp.eq.s32.totalorder %v479_v4, %v161_v55  ;;  %v261_v11 = vsel %vm257_vm1, %v496_v13, 0.0 }
  0x43   :  { %v217_v56 = vrot.slane %v216_v54, 4  ;;  %v263_v6 = vsel %vm259_vm3, %v500_v14, 0.0  ;;  %v271_v24 = vsel %vm72_vm0, %v261_v11, 0.0  ;;  %v278_v25 = vsel %vm72_vm0, %v262_v12, 0.0 }
  0x44   :  { %v223_v57 = vsel %vm72_vm0, %v212_v53, 0.0  ;;  %v265_v27 = vrot.slane %v264_v19, 4  ;;  %v285_v28 = vsel %vm72_vm0, %v263_v6, 0.0  ;;  %v272_v30 = vrot.slane %v271_v24, 4 }
  0x45   :  { %v218_v58 = vadd.f32 %v217_v56, %v216_v54  ;;  %v224_v59 = vrot.slane %v223_v57, 4  ;;  %v279_v31 = vrot.slane %v278_v25, 4  ;;  %v286_v35 = vrot.slane %v285_v28, 4 }
  0x46   :  { %v375_v60 = vpop.eup %374  ;;  %v266_v34 = vadd.f32 %v265_v27, %v264_v19  ;;  %v273_v38 = vadd.f32 %v272_v30, %v271_v24  ;;  %v456_v62 = vmov 1983009808  }
  0x47   :  { %v213_v63 = vcombine.high %v375_v60, %v375_v60  ;;  %v219_v1 = vrot.slane %v218_v58, 2  ;;  %v225_v2 = vadd.f32 %v224_v59, %v223_v57  ;;  %v230_v3 = vsel %vm72_vm0, %v375_v60, 0.0 }
  0x48   :  { %v231_v5 = vrot.slane %v230_v3, 4  ;;  %v280_v39 = vadd.f32 %v279_v31, %v278_v25  ;;  %v267_v41 = vrot.slane %v266_v34, 2  ;;  %v287_v42 = vadd.f32 %v286_v35, %v285_v28  ;;  %v326_v25 = vld [vmem:[#allocation7] sm:$0xf] }
  0x49   :  { %v220_v15 = vadd.f32 %v219_v1, %v218_v58  ;;  %v226_v17 = vrot.slane %v225_v2, 2  ;;  %v237_v18 = vsel %vm72_vm0, %v213_v63, 0.0  ;;  %v274_v43 = vrot.slane %v273_v38, 2 }
  0x4a   :  { %v232_v21 = vadd.f32 %v231_v5, %v230_v3  ;;  %v238_v9 = vrot.slane %v237_v18, 4  ;;  %v281_v44 = vrot.slane %v280_v39, 2  ;;  %v268_v45 = vadd.f32 %v267_v41, %v266_v34 }
  0x4b   :  { %v221_v22 = vrot.slane %v220_v15, 1  ;;  %v227_v23 = vadd.f32 %v226_v17, %v225_v2  ;;  %v288_v46 = vrot.slane %v287_v42, 2  ;;  %v275_v47 = vadd.f32 %v274_v43, %v273_v38 }
  0x4c   :  { %v233_v26 = vrot.slane %v232_v21, 2  ;;  %v239_v13 = vadd.f32 %v238_v9, %v237_v18  ;;  %v282_v48 = vadd.f32 %v281_v44, %v280_v39  ;;  %v269_v50 = vrot.slane %v268_v45, 1 }
  0x4d   :  { %v222_v7 = vadd.f32 %v221_v22, %v220_v15  ;;  %v228_v8 = vrot.slane %v227_v23, 1  ;;  %v289_v51 = vadd.f32 %v288_v46, %v287_v42  ;;  %v276_v54 = vrot.slane %v275_v47, 1 }
  0x4e   :  { %v234_v10 = vadd.f32 %v233_v26, %v232_v21  ;;  %v240_v29 = vrot.slane %v239_v13, 2  ;;  %v283_v55 = vrot.slane %v282_v48, 1  ;;  %v270_v58 = vadd.f32 %v269_v50, %v268_v45 }
  0x4f   :  { %v229_v32 = vadd.f32 %v228_v8, %v227_v23  ;;  %376 = vlog2.f32 %v222_v7  ;;  %v290_v59 = vrot.slane %v289_v51, 1  ;;  %v331_v63 = vunpack.c.l.s4 %v456_v62 }
  0x50   :  { %v235_v14 = vrot.slane %v234_v10, 1  ;;  %v241_v33 = vadd.f32 %v240_v29, %v239_v13  ;;  %v277_v3 = vadd.f32 %v276_v54, %v275_v47  ;;  %v284_v5 = vadd.f32 %v283_v55, %v282_v48 }
  0x51   :  { %378 = vlog2.f32 %v229_v32  ;;  %v291_v17 = vadd.f32 %v290_v59, %v289_v51  ;;  %vm314_vm0 = vcmask 1041409   ;;  %v332_v19 = vunpack.c.0.s8 %v331_v63 }
  0x52   :  { %v236_v36 = vadd.f32 %v235_v14, %v234_v10  ;;  %v242_v37 = vrot.slane %v241_v33, 1 }
  0x53   :  { %v335_v23 = vsub.s32 %v332_v19, %v479_v4 }
  0x54   :  { %v243_v40 = vadd.f32 %v242_v37, %v241_v33  ;;  %380 = vlog2.f32 %v236_v36 }
  0x56   :  { %382 = vlog2.f32 %v243_v40 }
  0x5c   :  { %v377_v49 = vpop.eup %376 }
  0x5d   :  { %v245_v52 = vmul.f32 0.6931472, %v377_v49 }
  0x5e   :  { %v379_v53 = vpop.eup %378 }
  0x5f   :  { %v247_v56 = vmul.f32 0.6931472, %v379_v53  ;;  %v252_v57 = vadd.f32 %v245_v52, %v516_v61 }
  0x61   :  { %v381_v60 = vpop.eup %380  ;;  %v253_v2 = vadd.f32 %v247_v56, %v518_v0  ;;  %v292_v18 = vsub.f32 %v252_v57, %v270_v58 }
  0x62   :  { %v249_v1 = vmul.f32 0.6931472, %v381_v60 }
  0x63   :  { %v383_v11 = vpop.eup %382  ;;  %v293_v21 = vsub.f32 %v253_v2, %v277_v3 }
  0x64   :  { %v251_v12 = vmul.f32 0.6931472, %v383_v11  ;;  %v254_v15 = vadd.f32 %v249_v1, %v523_v16 }
  0x66   :  { %v255_v61 = vadd.f32 %v251_v12, %v528_v20  ;;  %v294_v9 = vsub.f32 %v254_v15, %v284_v5 }
  0x68   :  { %v295_v6 = vsub.f32 %v255_v61, %v291_v17  ;;  %v315_v22 = vsel %vm314_vm0, %v294_v9, %v292_v18 }
  0x6a   :  { %v316_v24 = vsel %vm314_vm0, %v295_v6, %v293_v21 }
  0x6b   :  { %v329_v0 = vcombine.low %v315_v22, %v316_v24 }
  0x6d   :  { %v336_v26 = vrot.slane %v329_v0, %v335_v23 }
  0x6f   :  { %v338_v13 = vadd.f32 %v336_v26, %v326_v25 }
  0x71   :  { %339 = vst [vmem:[#allocation7] sm:$0xf] %v338_v13 }
  0x72   :  { %435 = shalt.err (!%p432_p0)
}
  0x73   :  { %349 = dma.vmem_to_hbm [thread:$0]  %s347_s1, 64, %s563_s2, [#allocation4]  }
  0x74   :  { %448 = dma.done.wait [#allocation4], 64  }
  0x75   :  { %449 = vsyncadd [#allocation4], 4294967232 }
  0x76   :  { %353 = vsyncpa [#allocation3], 1 }
  0x77   :  { %354 = vsyncpa [#allocation6], 1 }
  0x78   :  { %355 = vsyncpa [#allocation4], 1 }

</bundles_post_ra>
